<compile_context>
chip_gen: v7x
topology: tpu7x:2x2x1
jax: 0.10.0
libtpu: 0.0.40
codegen_flags: <defaults>
</compile_context>

<pallas_src>
import functools

import jax
import jax.numpy as jnp
from jax.experimental import pallas as pl
from jax.experimental.pallas import tpu as pltpu


def sage_layer_kernel(a_ref, x_ref, wl_ref, wr_ref, b_ref, out_ref, acc_ref,
                      *, apply_relu, tm, tk):
    """One SAGEConv layer: out[i] = relu?( (A @ X)[i] @ Wl + X[i] @ Wr + b ).

    Grid = (row tile i, reduction tile k).  X is fully VMEM-resident; neighbor and self feature
    tiles are dynamic slices of it.
    """
    i = pl.program_id(0)
    k = pl.program_id(1)

    # Mean-aggregation partial sum: A[i, k] @ X[k]  (bf16 MXU operands, f32 accumulation).
    xk = x_ref[pl.ds(pl.multiple_of(k * tk, tk), tk), :]
    part = jnp.dot(a_ref[...], xk, preferred_element_type=jnp.float32)

    @pl.when(k == 0)
    def _():
        acc_ref[...] = part          # direct write: no zero-init store + reload

    @pl.when(k > 0)
    def _():
        acc_ref[...] += part

    @pl.when(k == pl.num_programs(1) - 1)
    def _():
        agg = acc_ref[...].astype(jnp.bfloat16)
        xi = x_ref[pl.ds(pl.multiple_of(i * tm, tm), tm), :]
        # lin_l / lin_r as two MXU matmuls (no lane-axis concat copy in the epilogue).
        h = jnp.dot(agg, wl_ref[...], preferred_element_type=jnp.float32)
        h = h + jnp.dot(xi, wr_ref[...], preferred_element_type=jnp.float32)
        h = h + b_ref[...]
        if apply_relu:
            h = jnp.maximum(h, 0.0)
        out_ref[...] = h.astype(out_ref.dtype)


def _default_vmem_limit_bytes():
    # v7x has 64 MiB physical VMEM per TensorCore (vs 128 MiB on v5e/v6e); keep ~16 MiB headroom
    # on whatever chip we are on, and never exceed 96 MiB.
    try:
        cap = pltpu.get_tpu_info().vmem_capacity_bytes
        return int(min(96 * 1024 * 1024, max(32 * 1024 * 1024, cap - 16 * 1024 * 1024)))
    except Exception:  # conservative fallback that is safe on every generation
        return 48 * 1024 * 1024


def _default_tiles(n_pad):
    # 256-wide reduction tiles feed the 256-wide MXUs on v6e/v7x.  Keep the row tile at 128 when
    # there would otherwise be a single row tile, so the "parallel" axis still has >= 2 tiles to
    # shard across v7x's two TensorCores.  (On v5e, pass tk=128 explicitly to match its MXU.)
    tk = 256 if n_pad % 256 == 0 else 128
    tm = 256 if (n_pad % 256 == 0 and n_pad >= 512) else 128
    return tm, tk


def sage_layer(a, x, wl, wr, b, *, apply_relu, out_dtype, tm, tk, vmem_limit):
    """y = relu?( (A @ x) @ Wl + x @ Wr + b ) with padded, bf16 operands."""
    n = a.shape[0]
    fin = x.shape[1]
    fout = wl.shape[1]
    assert n % tm == 0 and n % tk == 0 and fin % 128 == 0 and fout % 128 == 0

    kernel = functools.partial(sage_layer_kernel, apply_relu=apply_relu, tm=tm, tk=tk)
    return pl.pallas_call(
        kernel,
        out_shape=jax.ShapeDtypeStruct((n, fout), out_dtype),
        grid_spec=pltpu.PrefetchScalarGridSpec(
            num_scalar_prefetch=0,
            grid=(n // tm, n // tk),
            in_specs=[
                # A row/col tile: the only streamed operand (default double-buffering).
                pl.BlockSpec((tm, tk), lambda i, k: (i, k)),
                # X fully resident, single-buffered (block index never changes).
                pl.BlockSpec((n, fin), lambda i, k: (0, 0), pipeline_mode=pl.Buffered(1)),
                # Grid-invariant weights / bias: single-buffered.
                pl.BlockSpec((fin, fout), lambda i, k: (0, 0), pipeline_mode=pl.Buffered(1)),
                pl.BlockSpec((fin, fout), lambda i, k: (0, 0), pipeline_mode=pl.Buffered(1)),
                pl.BlockSpec((1, fout), lambda i, k: (0, 0), pipeline_mode=pl.Buffered(1)),
            ],
            out_specs=pl.BlockSpec((tm, fout), lambda i, k: (i, 0)),
            scratch_shapes=[pltpu.VMEM((tm, fin), jnp.float32)],
        ),
        compiler_params=pltpu.CompilerParams(
            dimension_semantics=("parallel", "arbitrary"),
            vmem_limit_bytes=vmem_limit,
        ),
    )(a, x, wl, wr, b)


def _round_up(v, m):
    return ((v + m - 1) // m) * m


def _pad2d(arr, rows, cols, dtype):
    out = jnp.zeros((rows, cols), dtype)
    return out.at[: arr.shape[0], : arr.shape[1]].set(arr.astype(dtype))


def prepare_graphsage_inputs(a_norm, x, params):
    """One-time padding / casting, hoisted out of the steady-state forward path."""
    wl1, wr1, b1, wl2, wr2, b2 = params
    n, f = x.shape
    h_dim = wl1.shape[1]
    c = wl2.shape[1]

    n_pad = _round_up(n, 256)
    f_pad = _round_up(f, 128)
    h_pad = _round_up(h_dim, 128)
    c_pad = _round_up(c, 128)

    padded = dict(
        a=_pad2d(a_norm, n_pad, n_pad, jnp.bfloat16),   # padded rows AND columns are zero
        x=_pad2d(x, n_pad, f_pad, jnp.bfloat16),
        wl1=_pad2d(wl1, f_pad, h_pad, jnp.bfloat16),
        wr1=_pad2d(wr1, f_pad, h_pad, jnp.bfloat16),
        b1=_pad2d(b1, 1, h_pad, jnp.float32),
        wl2=_pad2d(wl2, h_pad, c_pad, jnp.bfloat16),
        wr2=_pad2d(wr2, h_pad, c_pad, jnp.bfloat16),
        b2=_pad2d(b2, 1, c_pad, jnp.float32),
    )
    return padded, (n, c)


def graphsage_forward_padded(padded, n, c, *, tm=None, tk=None):
    """Two SAGE layers on pre-padded/cast inputs.  Returns (n, c) f32 logits."""
    n_pad = padded["a"].shape[0]
    if tm is None or tk is None:
        tm, tk = _default_tiles(n_pad)
    vmem_limit = _default_vmem_limit_bytes()

    # Layer 1: h1 = relu(agg1 @ Wl1 + x @ Wr1 + b1).  dropout(p=0.5) is identity in eval mode.
    h1 = sage_layer(padded["a"], padded["x"], padded["wl1"], padded["wr1"], padded["b1"],
                    apply_relu=True, out_dtype=jnp.bfloat16, tm=tm, tk=tk, vmem_limit=vmem_limit)
    # Padded rows of h1 equal relu(b1) (nonzero) but A's padded columns are zero, so they do not
    # leak into layer-2 aggregation; padded output rows/cols are sliced away below.
    out = sage_layer(padded["a"], h1, padded["wl2"], padded["wr2"], padded["b2"],
                     apply_relu=False, out_dtype=jnp.float32, tm=tm, tk=tk, vmem_limit=vmem_limit)
    return out[:n, :c]


def graphsage_forward(a_norm, x, params, **kw):
    """Convenience one-shot wrapper (pads, casts, then runs the kernels)."""
    padded, (n, c) = prepare_graphsage_inputs(a_norm, x, params)
    return graphsage_forward_padded(padded, n, c, **kw)


def build_normalized_adjacency(edge_index, num_nodes):
    """A[i, j] = count(j->i) / deg_in(i); duplicate edges counted like PyG scatter-mean."""
    src, dst = edge_index[0], edge_index[1]
    counts = jnp.zeros((num_nodes, num_nodes), jnp.float32).at[dst, src].add(1.0)
    deg = counts.sum(axis=1, keepdims=True)
    return counts / jnp.maximum(deg, 1.0)


def linear_init(key, fan_in, fan_out):
    """PyTorch nn.Linear default init: U(-1/sqrt(fan_in), 1/sqrt(fan_in))."""
    kw, kb = jax.random.split(key)
    bound = 1.0 / jnp.sqrt(jnp.float32(fan_in))
    w = jax.random.uniform(kw, (fan_in, fan_out), jnp.float32, -bound, bound)
    b = jax.random.uniform(kb, (1, fan_out), jnp.float32, -bound, bound)
    return w, b


if __name__ == "__main__":
    # Small synthetic graph consistent with GraphSAGEModel(dim_in, 64, dim_out):
    #   N = 256 nodes, dim_in = 32 features, dim_h = 64, dim_out = 8 classes, E = 1024 edges.
    N, F, H, C, E = 256, 32, 64, 8, 1024

    key = jax.random.PRNGKey(0)
    k_x, k_e, k1l, k1r, k2l, k2r = jax.random.split(key, 6)

    x = jax.random.normal(k_x, (N, F), jnp.float32)
    edge_index = jax.random.randint(k_e, (2, E), 0, N, dtype=jnp.int32)
    a_norm = build_normalized_adjacency(edge_index, N)

    # sage1: lin_l (with bias) + lin_r (no bias); sage2 likewise.
    wl1, b1 = linear_init(k1l, F, H)
    wr1, _ = linear_init(k1r, F, H)
    wl2, b2 = linear_init(k2l, H, C)
    wr2, _ = linear_init(k2r, H, C)
    params = (wl1, wr1, b1, wl2, wr2, b2)

    # Pad / cast once (steady-state calls would reuse `padded`), then run the Pallas kernels.
    padded, (n_out, c_out) = prepare_graphsage_inputs(a_norm, x, params)
    out = graphsage_forward_padded(padded, n_out, c_out)
    out = jax.block_until_ready(out)

    # Pure-JAX f32 reference of the same math (kernel uses bf16 MXU operands -> loose tolerance).
    agg1 = a_norm @ x
    h1 = jnp.maximum(agg1 @ wl1 + x @ wr1 + b1, 0.0)
    agg2 = a_norm @ h1
    ref = agg2 @ wl2 + h1 @ wr2 + b2

    assert out.shape == (N, C)
    assert jnp.allclose(out, ref, atol=5e-2, rtol=5e-2), float(jnp.max(jnp.abs(out - ref)))

    print("KERNEL_OK")
</pallas_src>

<mosaic_0001>
module attributes {stable_mosaic.version = 11 : i64} {
  func.func @sage_layer_kernel(%arg0: i32, %arg1: i32, %arg2: memref<128x256xbf16, #tpu.memory_space<vmem>>, %arg3: memref<256x128xbf16, #tpu.memory_space<vmem>>, %arg4: memref<128x128xbf16, #tpu.memory_space<vmem>>, %arg5: memref<128x128xbf16, #tpu.memory_space<vmem>>, %arg6: memref<1x128xf32, #tpu.memory_space<vmem>>, %arg7: memref<128x128xbf16, #tpu.memory_space<vmem>>, %arg8: memref<128x128xf32, #tpu.memory_space<vmem>>) attributes {dimension_semantics = [#tpu.dimension_semantics<parallel>, #tpu.dimension_semantics<arbitrary>], iteration_bounds = array<i64: 2, 1>, scalar_prefetch = 0 : i64, scratch_operands = 1 : i64, tpu.core_type = #tpu.core_type<tc>, window_params = [{transform_indices = @transform_0, window_bounds = array<i64: 128, 256>}, {pipeline_mode = #tpu.pipeline_mode<synchronous>, transform_indices = @transform_1, window_bounds = array<i64: 256, 128>}, {pipeline_mode = #tpu.pipeline_mode<synchronous>, transform_indices = @transform_2, window_bounds = array<i64: 128, 128>}, {pipeline_mode = #tpu.pipeline_mode<synchronous>, transform_indices = @transform_3, window_bounds = array<i64: 128, 128>}, {pipeline_mode = #tpu.pipeline_mode<synchronous>, transform_indices = @transform_4, window_bounds = array<i64: 1, 128>}, {transform_indices = @transform_5, window_bounds = array<i64: 128, 128>}]} {
    %c256_i32 = arith.constant 256 : i32
    %0 = arith.muli %arg1, %c256_i32 : i32
    %1 = tpu.assume_multiple %0, 256 : i32
    %2 = arith.index_cast %1 : i32 to index
    %c0 = arith.constant 0 : index
    %3 = vector.load %arg3[%2, %c0] : memref<256x128xbf16, #tpu.memory_space<vmem>>, vector<256x128xbf16>
    %c0_0 = arith.constant 0 : index
    %c0_1 = arith.constant 0 : index
    %4 = vector.load %arg2[%c0_0, %c0_1] : memref<128x256xbf16, #tpu.memory_space<vmem>>, vector<128x256xbf16>
    %cst = arith.constant dense<0.000000e+00> : vector<128x128xf32>
    %5 = tpu.matmul %4, %3, %cst {dimension_numbers = #tpu.dot_dimension_numbers<[1], [0], [0], [1], [0, 0, 1, 1], [], []>} : vector<128x256xbf16>, vector<256x128xbf16>, vector<128x128xf32> -> vector<128x128xf32>
    %c0_i32 = arith.constant 0 : i32
    %6 = arith.cmpi eq, %arg1, %c0_i32 : i32
    %7 = arith.extui %6 : i1 to i32
    %c0_i32_2 = arith.constant 0 : i32
    %8 = arith.cmpi ne, %7, %c0_i32_2 : i32
    scf.if %8 {
      %c0_7 = arith.constant 0 : index
      %c0_8 = arith.constant 0 : index
      %15 = vector.load %arg8[%c0_7, %c0_8] : memref<128x128xf32, #tpu.memory_space<vmem>>, vector<128x128xf32>
      tpu.vector_store %arg8[%c0_7, %c0_8], %5 {strides = array<i32>} : memref<128x128xf32, #tpu.memory_space<vmem>>, vector<128x128xf32>,
    } else {
    }
    %c0_i32_3 = arith.constant 0 : i32
    %9 = arith.cmpi sgt, %arg1, %c0_i32_3 : i32
    %10 = arith.extui %9 : i1 to i32
    %c0_i32_4 = arith.constant 0 : i32
    %11 = arith.cmpi ne, %10, %c0_i32_4 : i32
    scf.if %11 {
      %c0_7 = arith.constant 0 : index
      %c0_8 = arith.constant 0 : index
      %15 = vector.load %arg8[%c0_7, %c0_8] : memref<128x128xf32, #tpu.memory_space<vmem>>, vector<128x128xf32>
      %16 = arith.addf %15, %5 : vector<128x128xf32>
      %c0_9 = arith.constant 0 : index
      %c0_10 = arith.constant 0 : index
      %17 = vector.load %arg8[%c0_9, %c0_10] : memref<128x128xf32, #tpu.memory_space<vmem>>, vector<128x128xf32>
      tpu.vector_store %arg8[%c0_9, %c0_10], %16 {strides = array<i32>} : memref<128x128xf32, #tpu.memory_space<vmem>>, vector<128x128xf32>,
    } else {
    }
    %c0_i32_5 = arith.constant 0 : i32
    %12 = arith.cmpi eq, %arg1, %c0_i32_5 : i32
    %13 = arith.extui %12 : i1 to i32
    %c0_i32_6 = arith.constant 0 : i32
    %14 = arith.cmpi ne, %13, %c0_i32_6 : i32
    scf.if %14 {
      %c0_7 = arith.constant 0 : index
      %c0_8 = arith.constant 0 : index
      %15 = vector.load %arg8[%c0_7, %c0_8] : memref<128x128xf32, #tpu.memory_space<vmem>>, vector<128x128xf32>
      %16 = arith.truncf %15 : vector<128x128xf32> to vector<128x128xbf16>
      %c128_i32 = arith.constant 128 : i32
      %17 = arith.muli %arg0, %c128_i32 : i32
      %18 = tpu.assume_multiple %17, 128 : i32
      %19 = arith.index_cast %18 : i32 to index
      %c0_9 = arith.constant 0 : index
      %20 = vector.load %arg3[%19, %c0_9] : memref<256x128xbf16, #tpu.memory_space<vmem>>, vector<128x128xbf16>
      %c0_10 = arith.constant 0 : index
      %c0_11 = arith.constant 0 : index
      %21 = vector.load %arg4[%c0_10, %c0_11] : memref<128x128xbf16, #tpu.memory_space<vmem>>, vector<128x128xbf16>
      %cst_12 = arith.constant dense<0.000000e+00> : vector<128x128xf32>
      %22 = tpu.matmul %16, %21, %cst_12 {dimension_numbers = #tpu.dot_dimension_numbers<[1], [0], [0], [1], [0, 0, 1, 1], [], []>} : vector<128x128xbf16>, vector<128x128xbf16>, vector<128x128xf32> -> vector<128x128xf32>
      %c0_13 = arith.constant 0 : index
      %c0_14 = arith.constant 0 : index
      %23 = vector.load %arg5[%c0_13, %c0_14] : memref<128x128xbf16, #tpu.memory_space<vmem>>, vector<128x128xbf16>
      %cst_15 = arith.constant dense<0.000000e+00> : vector<128x128xf32>
      %24 = tpu.matmul %20, %23, %cst_15 {dimension_numbers = #tpu.dot_dimension_numbers<[1], [0], [0], [1], [0, 0, 1, 1], [], []>} : vector<128x128xbf16>, vector<128x128xbf16>, vector<128x128xf32> -> vector<128x128xf32>
      %25 = arith.addf %22, %24 : vector<128x128xf32>
      %c0_16 = arith.constant 0 : index
      %c0_17 = arith.constant 0 : index
      %26 = vector.load %arg6[%c0_16, %c0_17] : memref<1x128xf32, #tpu.memory_space<vmem>>, vector<1x128xf32>
      %27 = vector.broadcast %26 : vector<1x128xf32> to vector<128x128xf32>
      %28 = arith.addf %25, %27 : vector<128x128xf32>
      %cst_18 = arith.constant 0.000000e+00 : f32
      %29 = vector.broadcast %cst_18 : f32 to vector<128x128xf32>
      %30 = arith.maximumf %28, %29 : vector<128x128xf32>
      %31 = arith.truncf %30 : vector<128x128xf32> to vector<128x128xbf16>
      %c0_19 = arith.constant 0 : index
      %c0_20 = arith.constant 0 : index
      %32 = vector.load %arg7[%c0_19, %c0_20] : memref<128x128xbf16, #tpu.memory_space<vmem>>, vector<128x128xbf16>
      tpu.vector_store %arg7[%c0_19, %c0_20], %31 {strides = array<i32>} : memref<128x128xbf16, #tpu.memory_space<vmem>>, vector<128x128xbf16>,
    } else {
    }
    return
  }
  func.func @transform_0(%arg0: i32, %arg1: i32) -> (i32, i32) {
    %c0_i32 = arith.constant 0 : i32
    return %arg0, %arg1 : i32, i32
  }
  func.func @transform_1(%arg0: i32, %arg1: i32) -> (i32, i32) {
    %c0_i32 = arith.constant 0 : i32
    %c0_i32_0 = arith.constant 0 : i32
    %c0_i32_1 = arith.constant 0 : i32
    return %c0_i32, %c0_i32_0 : i32, i32
  }
  func.func @transform_2(%arg0: i32, %arg1: i32) -> (i32, i32) {
    %c0_i32 = arith.constant 0 : i32
    %c0_i32_0 = arith.constant 0 : i32
    %c0_i32_1 = arith.constant 0 : i32
    return %c0_i32, %c0_i32_0 : i32, i32
  }
  func.func @transform_3(%arg0: i32, %arg1: i32) -> (i32, i32) {
    %c0_i32 = arith.constant 0 : i32
    %c0_i32_0 = arith.constant 0 : i32
    %c0_i32_1 = arith.constant 0 : i32
    return %c0_i32, %c0_i32_0 : i32, i32
  }
  func.func @transform_4(%arg0: i32, %arg1: i32) -> (i32, i32) {
    %c0_i32 = arith.constant 0 : i32
    %c0_i32_0 = arith.constant 0 : i32
    %c0_i32_1 = arith.constant 0 : i32
    return %c0_i32, %c0_i32_0 : i32, i32
  }
  func.func @transform_5(%arg0: i32, %arg1: i32) -> (i32, i32) {
    %c0_i32 = arith.constant 0 : i32
    %c0_i32_0 = arith.constant 0 : i32
    return %arg0, %c0_i32 : i32, i32
  }
}

</mosaic_0001>

<bundles_post_ra>
// kernel: tpu_custom_call.1
= control target key start
LH: loop header
LB: loop body
LE: loop exit
PB: predicated region body
PF: predicated region fallthrough
CT: control target
= control target key end

     0   :  { %10 = vsyncpa [#allocation4], 0  ;;  %s2456_s0 = inlined_call_operand.hbm [shape: bf16[256,256], index: 0, kind: input, shape index: {}]   ;;  %s2457_s1 = inlined_call_operand.hbm [shape: bf16[256,128], index: 1, kind: input, shape index: {}]   ;;  %s2458_s2 = inlined_call_operand.hbm [shape: bf16[128,128], index: 2, kind: input, shape index: {}]   ;;  %s2459_s3 = inlined_call_operand.hbm [shape: bf16[128,128], index: 3, kind: input, shape index: {}]   ;;  %s2460_s4 = inlined_call_operand.vmem [shape: f32[1,128], index: 4, kind: input, shape index: {}]   ;;  %s2461_s5 = inlined_call_operand.hbm [shape: bf16[256,128], index: 5, kind: output, shape index: {}]  }
   0x1   :  { %12 = vsyncpa [#allocation4 + $0x1], 0 }
   0x2   :  { %13 = vsyncpa [#allocation7], 0 }
   0x3   :  { %14 = vsyncpa [#allocation10], 0 }
   0x4   :  { %15 = vsyncpa [#allocation5], 0 }
   0x5   :  { %17 = vsyncpa [#allocation5 + $0x1], 0  ;;  %s2123_s18 = smov 0   ;;  %s2125_s19 = smov 0  }
   0x6   :  { %s2127_s20 = smov 0   ;;  %s2129_s21 = smov 0  }
   0x7   :  { %s2131_s22 = smov 0   ;;  %s2133_s23 = smov 0  }
   0x8 LB: > { %2468 = sst [smem:[#allocation16_spill]] %s2060_s18  ;;  %s1374_s24 = sadd.s32 4294967295, %s2080_s23   ;;  %s2080_s23 = sphi %s2133_s23, %s23_s23   ;;  %s2076_s22 = sphi %s2131_s22, %s2491_s22   ;;  %s2072_s21 = sphi %s2129_s21, %s2490_s21   ;;  %s2068_s20 = sphi %s2127_s20, %s2489_s20   ;;  %s2064_s19 = sphi %s2125_s19, %s2488_s19   ;;  %s2060_s18 = sphi %s2123_s18, %s2487_s18  }
   0x9   : > { %s1375_s25 = sadd.s32 4294967294, %s2080_s23   ;;  %p57_p0 = scmp.ne.s32.totalorder %s2064_s19, %s2060_s18 }
   0xa   : > { %p2157_p1 = scmp.eq.s32.totalorder %s1374_s24, 0  ;;  %p2161_p2 = scmp.eq.s32.totalorder %s1374_s24, 1 }
   0xb   : > { %p171_p3 = scmp.eq.s32.totalorder %s1375_s25, 1  ;;  %p1376_p5 = scmp.ge.s32.totalorder %s2080_s23, 1 }
   0xc   : > { %s2469_s26 = scalar_select %p2157_p1, 1, 0 }
   0xd   : > { %s2470_s27 = scalar_select %p2161_p2, 1, 0 }
   0xe   : > { %p2167_p4 = por %p2157_p1, %p57_p0  ;;  %p2172_p6 = por %p171_p3, %p57_p0 }
   0xf   : > { %p178_p7 = scmp.lt.s32.totalorder %s2080_s23, 3  ;;  %s2082_s6 = smov [#allocation6]  }
  0x10   : > { %s2471_s28 = scalar_select %p2167_p4, 1, 0 }
  0x11   : > { %s2472_s29 = scalar_select %p2172_p6, 1, 0 }
  0x12   : > { %p2177_p8 = pnand %p1376_p5, %p178_p7  ;;  %s190_s7 = sshll.u32 %s2082_s6, 4  ;;  %s2181_s7 = int_to_ptr.vmem [resolvable:$true] %s190_s7 }
  0x13   : > { %2473 = sst [smem:[#allocation17_spill]] %s2472_s29  ;;  %s2083_s9 = smov [#allocation8]  }
  0x14   : > { %s2474_s30 = scalar_select %p2177_p8, 1, 0 }
  0x15   : > { %p1729_p9 = pneg %p2177_p8  ;;  %s203_s10 = sshll.u32 %s2083_s9, 4  ;;  %s2192_s10 = int_to_ptr.vmem [resolvable:$true] %s203_s10 }
  0x16   : > { %s2084_s11 = smov [#allocation9]   ;;  %s1876_s15 = scalar_lea.hbm %s2457_s1, 2048 }
  0x17   : > { %p2188_p11 = pnand %p1729_p9, %p2157_p1  ;;  %s2194_s12 = sshll.u32 %s2084_s11, 4  ;;  %s217_s12 = int_to_ptr.vmem [resolvable:$true] %s2194_s12 }
  0x18   : > { %p1877_p12 = scmp.ne.s32.totalorder %s2457_s1, %s1876_s15  ;;  %p1883_p5 = scmp.lt.u32.totalorder %s1876_s15, %s2457_s1 }
  0x19   : > { %p2204_p13 = pneg %p2188_p11 }
  0x1b   : > { %p1879_p0 = pnand %p2204_p13, %p1877_p12 }
  0x1d   : > { %p1880_p3 = pneg %p1879_p0 }
  0x1f   : > { %p1885_p7 = pnand %p1883_p5, %p1880_p3 }
  0x21   : > { %1888 = shalt.err (!%p1885_p7)
}
  0x22   : > { %s1889_s9 = scalar_lea.vmem %s2181_s7, 2048  ;;  %p1897_p1 = scmp.lt.s32.totalorder %s2181_s7, %s2181_s7 }
  0x23   : > { %p1890_p9 = scmp.ne.s32.totalorder %s2181_s7, %s1889_s9  ;;  %p1898_p4 = scmp.lt.s32.totalorder %s1889_s9, %s1889_s9 }
  0x25   : > { %p1892_p10 = pnand %p1890_p9, %p2204_p13  ;;  %p1899_p12 = por %p1898_p4, %p1897_p1 }
  0x27   : > { %p1893_p6 = pneg %p1892_p10 }
  0x29   : > { %p1900_p0 = pnand %p1899_p12, %p1893_p6 }
  0x2b   : > { %1903 = shalt.err (!%p1900_p0)
}
  0x2c   : > { %s2085_s11 = smov 64   ;;  %s2086_s13 = smov 4  }
  0x2d   : > { %1732 = dma.hbm_to_vmem [thread:$0]  (!%p2188_p11), %s2457_s1, 2048, %s2181_s7, [#allocation7], %s2085_s11, %s2085_s11, %s2086_s13  }
  0x2e   : > { %s1904_s25 = scalar_lea.hbm %s2458_s2, 1024 }
  0x2f   : > { %p1905_p1 = scmp.ne.s32.totalorder %s2458_s2, %s1904_s25  ;;  %p1911_p10 = scmp.lt.u32.totalorder %s1904_s25, %s2458_s2 }
  0x31   : > { %p1907_p4 = pnand %p1905_p1, %p2204_p13 }
  0x33   : > { %p1908_p6 = pneg %p1907_p4 }
  0x35   : > { %p1913_p3 = pnand %p1911_p10, %p1908_p6 }
  0x37   : > { %1916 = shalt.err (!%p1913_p3)
}
  0x38   : > { %s1917_s7 = scalar_lea.vmem %s2192_s10, 1024  ;;  %p1925_p12 = scmp.lt.s32.totalorder %s2192_s10, %s2192_s10 }
  0x39   : > { %p1918_p5 = scmp.ne.s32.totalorder %s2192_s10, %s1917_s7  ;;  %p1926_p0 = scmp.lt.s32.totalorder %s1917_s7, %s1917_s7 }
  0x3b   : > { %p1920_p7 = pnand %p1918_p5, %p2204_p13  ;;  %p1927_p1 = por %p1926_p0, %p1925_p12 }
  0x3d   : > { %p1921_p9 = pneg %p1920_p7 }
  0x3f   : > { %p1928_p4 = pnand %p1927_p1, %p1921_p9 }
  0x41   : > { %1931 = shalt.err (!%p1928_p4)
}
  0x42   : > { %1735 = dma.hbm_to_vmem [thread:$0]  (!%p2188_p11), %s2458_s2, 1024, %s2192_s10, [#allocation7], %s2085_s11, %s2085_s11, %s2086_s13  }
  0x43   : > { %s1932_s16 = scalar_lea.hbm %s2459_s3, 1024 }
  0x44   : > { %p1933_p6 = scmp.ne.s32.totalorder %s2459_s3, %s1932_s16  ;;  %p1939_p5 = scmp.lt.u32.totalorder %s1932_s16, %s2459_s3 }
  0x46   : > { %p1935_p10 = pnand %p1933_p6, %p2204_p13 }
  0x48   : > { %p1936_p3 = pneg %p1935_p10 }
  0x4a   : > { %p1941_p7 = pnand %p1939_p5, %p1936_p3 }
  0x4c   : > { %1944 = shalt.err (!%p1941_p7)
}
  0x4d   : > { %s1945_s7 = scalar_lea.vmem %s217_s12, 1024  ;;  %p1953_p1 = scmp.lt.s32.totalorder %s217_s12, %s217_s12 }
  0x4e   : > { %p1946_p9 = scmp.ne.s32.totalorder %s217_s12, %s1945_s7  ;;  %p1954_p4 = scmp.lt.s32.totalorder %s1945_s7, %s1945_s7 }
  0x50   : > { %p1948_p12 = pnand %p1946_p9, %p2204_p13  ;;  %p1955_p8 = por %p1954_p4, %p1953_p1 }
  0x52   : > { %p1949_p0 = pneg %p1948_p12 }
  0x54   : > { %p1956_p2 = pnand %p1955_p8, %p1949_p0 }
  0x56   : > { %1959 = shalt.err (!%p1956_p2)
}
  0x57   : > { %1738 = dma.hbm_to_vmem [thread:$0]  (!%p2188_p11), %s2459_s3, 1024, %s217_s12, [#allocation10], %s2085_s11, %s2085_s11, %s2086_s13  }
  0x58   : > { %s44_s24 = sadd.s32 1, %s2068_s20  ;;  %s35_s8 = sadd.s32 1, %s2076_s22 }
  0x59   : > { %p51_p2 = scmp.ne.s32.totalorder %s2068_s20, %s2064_s19  ;;  %p37_p8 = scmp.ge.s32.totalorder %s35_s8, 2 }
  0x5a   : > { %p52_p13 = scmp.eq.s32.totalorder %s2080_s23, 0  ;;  %p2477_p6 = scmp.ne.s32.totalorder %s2470_s27, 0 }
  0x5b   : > { %p1750_p3 = scmp.lt.s32.totalorder %s2080_s23, 2  ;;  %s2493_s8 = smov (%p37_p8, %s35_s8), 0 }
  0x5c   : > { %p2283_p10 = por %p2477_p6, %p51_p2  ;;  %p53_p5 = por %p52_p13, %p51_p2 }
  0x5d   : > { %s233_s14 = sand.u32 1, %s2068_s20   ;;  %s39_s15 = ssub.s32 %s2076_s22, %s2493_s8 }
  0x5e   : > { %p42_p7 = scmp.eq.s32.totalorder %s39_s15, 0  ;;  %s1381_s12 = sshll.u32 %s233_s14, 7 }
  0x5f   : > { %s1472_s11 = sshll.u32 %s2076_s22, 11  ;;  %s237_s25 = scalar_lea.vmem [#allocation3], %s1381_s12 }
  0x60   : > { %s2295_s13 = scalar_select %p42_p7, %s2068_s20, %s44_s24  }
  0x61   : > { %s2300_s27 = scalar_lea.hbm %s2456_s0, %s1472_s11  ;;  %s247_s6 = sshll.u32 %s237_s25, 4  ;;  %s2302_s6 = int_to_ptr.vmem [resolvable:$true] %s247_s6 }
  0x62   : > { %p2306_p11 = pnand %p1750_p3, %p53_p5  ;;  %s2310_s7 = scalar_lea.sflag [#allocation4], %s233_s14 }
  0x63   : > { %s1960_s10 = scalar_lea.hbm %s2300_s27, 2048  ;;  %s1965_s15 = scalar_lea.hbm %s2456_s0, 4096 }
  0x64   : > { %p1961_p9 = scmp.ne.s32.totalorder %s2300_s27, %s1960_s10  ;;  %p1962_p12 = pneg %p2306_p11 }
  0x65   : > { %p1966_p4 = scmp.lt.u32.totalorder %s2300_s27, %s2456_s0  ;;  %p1967_p2 = scmp.lt.u32.totalorder %s1965_s15, %s1960_s10 }
  0x66   : > { %p1963_p0 = pnand %p1962_p12, %p1961_p9  ;;  %p1969_p13 = scmp.lt.u32.totalorder %s1960_s10, %s2300_s27 }
  0x67   : > { %p1968_p8 = por %p1967_p2, %p1966_p4 }
  0x68   : > { %p1964_p1 = pneg %p1963_p0 }
  0x69   : > { %p1970_p6 = por %p1969_p13, %p1968_p8 }
  0x6b   : > { %p1971_p3 = pnand %p1970_p6, %p1964_p1 }
  0x6d   : > { %1974 = shalt.err (!%p1971_p3)
}
  0x6e   : > { %s1975_s14 = scalar_lea.vmem %s2302_s6, 2048  ;;  %s2087_s16 = smov [#allocation3]  }
  0x6f   : > { %p1976_p5 = scmp.ne.s32.totalorder %s2302_s6, %s1975_s14  ;;  %s1980_s17 = sshll.u32 %s2087_s16, 4  ;;  %s1981_s17 = int_to_ptr.vmem [resolvable:$false] %s1980_s17 }
  0x70   : > { %s1982_s25 = scalar_lea.vmem %s1981_s17, 4096  ;;  %p1983_p0 = scmp.lt.s32.totalorder %s2302_s6, %s1981_s17 }
  0x71   : > { %p1978_p7 = pnand %p1976_p5, %p1962_p12  ;;  %p1984_p4 = scmp.lt.s32.totalorder %s1982_s25, %s1975_s14 }
  0x73   : > { %p1979_p9 = pneg %p1978_p7  ;;  %p1985_p2 = por %p1984_p4, %p1983_p0 }
  0x75   : > { %p1986_p8 = pnand %p1985_p2, %p1979_p9 }
  0x77   : > { %1989 = shalt.err (!%p1986_p8)
}
  0x78   : > { %s2088_s10 = smov 128   ;;  %s2089_s18 = smov 8  }
  0x79   : > { %1742 = dma.hbm_to_vmem [thread:$0]  (!%p2306_p11), %s2300_s27, 2048, %s2302_s6, %s2310_s7, %s2088_s10, %s2088_s10, %s2089_s18  }
  0x7a   : > { %p2480_p12 = scmp.ne.s32.totalorder %s2474_s30, 0 }
  0x7b   : > { %s2341_s24 = sand.u32 (!%p2480_p12), 1, %s2064_s19   ;;  %p2481_p1 = scmp.ne.s32.totalorder (!%p2480_p12), %s2471_s28, 0 }
  0x7c   : > { %259 = sbr.rel (%p2480_p12) target bundleno = 681 (0x2a9), region = 40  ;;  %s1386_s15 = sshll.u32 (!%p2480_p12), %s2341_s24, 7 }
  0x7d   : > { %s262_s12 = scalar_lea.sflag (!%p2480_p12), [#allocation4], %s2341_s24  ;;  %s2345_s11 = scalar_lea.vmem (!%p2480_p12), [#allocation3], %s1386_s15 }
  0x83   : > { %2043 = dma.done.wait (%p2481_p1), %s262_s12, 2048  }
  0x84   : > { %2045 = vsyncadd (%p2481_p1), %s262_s12, 4294965248  ;;  %p2482_p11 = scmp.ne.s32.totalorder %s2469_s26, 0 }
  0x86   : > { %2047 = dma.done.wait (%p2482_p11), [#allocation7], 3072  }
  0x87   : > { %2049 = vsyncadd (%p2482_p11), [#allocation7], 4294964224 }
  0x88   : > { %2051 = dma.done.wait (%p2482_p11), [#allocation10], 1024  }
  0x89   : > { %2053 = vsyncadd (%p2482_p11), [#allocation10], 4294966272  ;;  %v1812_v0 = vld [vmem:[#allocation6 + $0x40] sm:$0xff]   ;;  %v1814_v2 = vld [vmem:[#allocation6 + $0x48] sm:$0xff]   ;;  %s1423_s26 = sshll.u32 %s2072_s21, 7  ;;  %s1390_s7 = sshll.u32 %s2341_s24, 6 }
  0x8a   : > { %v1813_v1 = vld [vmem:[#allocation6] sm:$0xff]   ;;  %1537 = vmatprep.subr.bf16.mxu0 %v1812_v0  ;;  %v1815_v3 = vld [vmem:[#allocation6 + $0x8] sm:$0xff]   ;;  %v1816_v4 = vld [vmem:[#allocation6 + $0x50] sm:$0xff]   ;;  %s734_s28 = sshra.s32 %s1423_s26, 3  ;;  %s2390_s14 = scalar_lea.vmem [#allocation11], %s1390_s7 }
  0x8b   : > { %1538 = vmatpush3.bf16.msra.mxu0 %v1813_v1  ;;  %v1817_v5 = vld [vmem:[#allocation6 + $0x10] sm:$0xff]   ;;  %v1818_v6 = vld [vmem:[#allocation6 + $0x58] sm:$0xff]   ;;  %v1820_v8 = vld [vmem:[#allocation6 + $0x60] sm:$0xff]   ;;  %s1424_s30 = sshll.u32 %s734_s28, 2  ;;  %s1257_s16 = sshll.u32 %s2390_s14, 4  ;;  %s2400_s16 = int_to_ptr.vmem [resolvable:$true] %s1257_s16 }
  0x8c   : > { %1539 = vmatprep.subr.bf16.mxu0 %v1814_v2  ;;  %v1819_v7 = vld [vmem:[#allocation6 + $0x18] sm:$0xff]   ;;  %v1821_v9 = vld [vmem:[#allocation6 + $0x20] sm:$0xff]   ;;  %v1822_v10 = vld [vmem:[#allocation6 + $0x68] sm:$0xff]   ;;  %s2363_s27 = scalar_lea.vmem [#allocation6], %s1424_s30  ;;  %s1489_s17 = sshll.u32 %s2072_s21, 10 }
  0x8d   : > { %v1830_v11 = vld [vmem:[%s2345_s11 + $0x4] ss:$8 sps:$4 sm:$0xff]   ;;  %v1824_v13 = vld [vmem:[#allocation6 + $0x70] sm:$0xff]   ;;  %v1826_v15 = vld [vmem:[#allocation6 + $0x78] sm:$0xff]   ;;  %s2405_s18 = scalar_lea.hbm %s2461_s5, %s1489_s17  ;;  %s1244_s15 = scalar_lea.sflag [#allocation5], %s2341_s24 }
  0x8e   : > { %v1823_v12 = vld [vmem:[#allocation6 + $0x28] sm:$0xff]   ;;  %569 = vmatprep.mubr.bf16.mxu0 %v1830_v11  ;;  %v1825_v14 = vld [vmem:[#allocation6 + $0x30] sm:$0xff]   ;;  %v1827_v16 = vld [vmem:[#allocation6 + $0x38] sm:$0xff]   ;;  %s1990_s21 = scalar_lea.vmem %s2400_s16, 1024  ;;  %s2090_s12 = smov [#allocation11]  }
  0x8f   : > { %1540 = vmatpush3.bf16.msra.mxu0 %v1815_v3  ;;  %v1852_v17 = vld [vmem:[#allocation9] sm:$0xff]   ;;  %v1853_v18 = vld [vmem:[#allocation9 + $0x8] sm:$0xff]   ;;  %v1831_v20 = vld [vmem:[%s2345_s11 + $0x14] ss:$8 sps:$4 sm:$0xff]   ;;  %p1991_p13 = scmp.ne.s32.totalorder %s2400_s16, %s1990_s21 }
  0x90   : > { %1541 = vmatprep.subr.bf16.mxu0 %v1816_v4  ;;  %v1828_v19 = vld [vmem:[%s2345_s11] ss:$8 sps:$4 sm:$0xff]   ;;  %1633 = vmatprep.subr.bf16.mxu1 %v1852_v17  ;;  %v1854_v21 = vld [vmem:[#allocation9 + $0x10] sm:$0xff]   ;;  %v1855_v22 = vld [vmem:[#allocation9 + $0x18] sm:$0xff]  }
  0x91   : > { %1634 = vmatpush3.bf16.msra.mxu1 %v1852_v17  ;;  %v1860_v23 = vld [vmem:[%s2363_s27] sm:$0xff]   ;;  %v1833_v24 = vld [vmem:[%s2345_s11 + $0x10] ss:$8 sps:$4 sm:$0xff]   ;;  %v1857_v27 = vld [vmem:[#allocation9 + $0x28] sm:$0xff]   ;;  %p1992_p6 = pnand %p1991_p13, %p2283_p10 }
  0x92   : > { %1635 = vmatprep.subr.bf16.mxu1 %v1853_v18  ;;  %1649 = vmatprep.mubr.bf16.mxu1 %v1860_v23  ;;  %v1834_v25 = vld [vmem:[%s2345_s11 + $0x24] ss:$8 sps:$4 sm:$0xff]   ;;  %v1836_v28 = vld [vmem:[%s2345_s11 + $0x20] ss:$8 sps:$4 sm:$0xff]   ;;  %v1837_v29 = vld [vmem:[%s2345_s11 + $0x34] ss:$8 sps:$4 sm:$0xff]  }
  0x93   : > { %1542 = vmatpush3.bf16.msra.mxu0 %v1817_v5  ;;  %v1856_v26 = vld [vmem:[#allocation9 + $0x20] sm:$0xff]   ;;  %v1858_v30 = vld [vmem:[#allocation9 + $0x30] sm:$0xff]   ;;  %v1859_v31 = vld [vmem:[#allocation9 + $0x38] sm:$0xff]   ;;  %p1993_p3 = pneg %p1992_p6 }
  0x94   : > { %1543 = vmatprep.subr.bf16.mxu0 %v1818_v6  ;;  %v1839_v32 = vld [vmem:[%s2345_s11 + $0x30] ss:$8 sps:$4 sm:$0xff]   ;;  %v1840_v33 = vld [vmem:[%s2345_s11 + $0x44] ss:$8 sps:$4 sm:$0xff]   ;;  %v1842_v38 = vld [vmem:[%s2345_s11 + $0x40] ss:$8 sps:$4 sm:$0xff]  }
  0x95   : > { %1636 = vmatpush3.bf16.msra.mxu1 %v1853_v18  ;;  %v1862_v34 = vld [vmem:[#allocation8] sm:$0xff]   ;;  %v1861_v35 = vld [vmem:[%s2363_s27 + $0x8] sm:$0xff]   ;;  %v1864_v36 = vld [vmem:[%s2363_s27 + $0x10] sm:$0xff]  }
  0x96   : > { %1637 = vmatprep.subr.bf16.mxu1 %v1854_v21  ;;  %v1863_v37 = vld [vmem:[#allocation8 + $0x8] sm:$0xff]   ;;  %v1843_v39 = vld [vmem:[%s2345_s11 + $0x54] ss:$8 sps:$4 sm:$0xff]   ;;  %v1868_v42 = vld [vmem:[%s2363_s27 + $0x20] sm:$0xff]  }
  0x97   : > { %1544 = vmatpush3.bf16.msra.mxu0 %v1819_v7  ;;  %v1866_v40 = vld [vmem:[#allocation8 + $0x10] sm:$0xff]   ;;  %v1865_v41 = vld [vmem:[%s2363_s27 + $0x18] sm:$0xff]   ;;  %v1846_v45 = vld [vmem:[%s2345_s11 + $0x64] ss:$8 sps:$4 sm:$0xff]  }
  0x98   : > { %1545 = vmatprep.subr.bf16.mxu0 %v1820_v8  ;;  %v1867_v43 = vld [vmem:[#allocation8 + $0x18] sm:$0xff]   ;;  %v1869_v46 = vld [vmem:[%s2363_s27 + $0x28] sm:$0xff]   ;;  %v1870_v50 = vld [vmem:[#allocation8 + $0x20] sm:$0xff]  }
  0x99   : > { %1638 = vmatpush3.bf16.msra.mxu1 %v1854_v21  ;;  %v1845_v44 = vld [vmem:[%s2345_s11 + $0x50] ss:$8 sps:$4 sm:$0xff]   ;;  %v1848_v47 = vld [vmem:[%s2345_s11 + $0x60] ss:$8 sps:$4 sm:$0xff]   ;;  %v1849_v48 = vld [vmem:[%s2345_s11 + $0x74] ss:$8 sps:$4 sm:$0xff]  }
  0x9a   : > { %1639 = vmatprep.subr.bf16.mxu1 %v1855_v22  ;;  %v1851_v49 = vld [vmem:[%s2345_s11 + $0x70] ss:$8 sps:$4 sm:$0xff]   ;;  %v1871_v51 = vld [vmem:[#allocation8 + $0x28] sm:$0xff]   ;;  %s1994_s11 = sshll.u32 %s2090_s12, 4  ;;  %s1995_s11 = int_to_ptr.vmem [resolvable:$false] %s1994_s11 }
  0x9b   : > { %1546 = vmatpush3.bf16.msra.mxu0 %v1821_v9  ;;  %v1872_v52 = vld [vmem:[%s2363_s27 + $0x30] sm:$0xff]   ;;  %v1873_v53 = vld [vmem:[%s2363_s27 + $0x38] sm:$0xff]   ;;  %s1996_s26 = scalar_lea.vmem %s1995_s11, 2048  ;;  %p1997_p5 = scmp.lt.s32.totalorder %s2400_s16, %s1995_s11 }
  0x9c   : > { %1547 = vmatprep.subr.bf16.mxu0 %v1822_v10  ;;  %v1874_v54 = vld [vmem:[#allocation8 + $0x30] sm:$0xff]   ;;  %v1875_v55 = vld [vmem:[#allocation8 + $0x38] sm:$0xff]   ;;  %p1998_p7 = scmp.lt.s32.totalorder %s1996_s26, %s1990_s21 }
  0x9d   : > { %1640 = vmatpush3.bf16.msra.mxu1 %v1855_v22 }
  0x9e   : > { %1641 = vmatprep.subr.bf16.mxu1 %v1856_v26  ;;  %p1999_p9 = por %p1998_p7, %p1997_p5 }
  0x9f   : > { %1548 = vmatpush3.bf16.msra.mxu0 %v1823_v12 }
  0xa0   : > { %1549 = vmatprep.subr.bf16.mxu0 %v1824_v13  ;;  %p2000_p0 = pnand %p1999_p9, %p1993_p3 }
  0xa1   : > { %1642 = vmatpush3.bf16.msra.mxu1 %v1856_v26 }
  0xa2   : > { %1643 = vmatprep.subr.bf16.mxu1 %v1857_v27 }
  0xa3   : > { %1550 = vmatpush3.bf16.msra.mxu0 %v1825_v14 }
  0xa4   : > { %1551 = vmatprep.subr.bf16.mxu0 %v1826_v15 }
  0xa5   : > { %1644 = vmatpush3.bf16.msra.mxu1 %v1857_v27 }
  0xa6   : > { %1645 = vmatprep.subr.bf16.mxu1 %v1858_v30 }
  0xa7   : > { %1552 = vmatpush3.bf16.msra.mxu0 %v1827_v16 }
  0xa9   : > { %1646 = vmatpush3.bf16.msra.mxu1 %v1858_v30 }
  0xaa   : > { %570 = vmatmul.mubr.bf16.vlgmr.msra.gmra.mrb[0].mxu0 %v1828_v19  ;;  %1647 = vmatprep.subr.bf16.mxu1 %v1859_v31 }
  0xab   : > { %577 = vmatprep.mubr.bf16.mxu0 %v1831_v20 }
  0xad   : > { %1648 = vmatpush3.bf16.msra.mxu1 %v1859_v31 }
  0xae   : > { %1665 = vmatprep.subr.bf16.mxu1 %v1862_v34 }
  0xb0   : > { %1650 = vmatmul.mubr.bf16.vlgmr.msra.gmra.mrb[0].mxu1 %v1861_v35 }
  0xb1   : > { %1666 = vmatpush3.bf16.msra.mxu1 %v1862_v34  ;;  %1653 = vmatprep.mubr.bf16.mxu1 %v1864_v36 }
  0xb2   : > { %578 = vmatmul.mubr.bf16.gmra.mrb[4].mxu0 %v1833_v24  ;;  %1667 = vmatprep.subr.bf16.mxu1 %v1863_v37 }
  0xb3   : > { %585 = vmatprep.mubr.bf16.mxu0 %v1834_v25 }
  0xb5   : > { %1668 = vmatpush3.bf16.msra.mxu1 %v1863_v37 }
  0xb6   : > { %1669 = vmatprep.subr.bf16.mxu1 %v1866_v40 }
  0xb8   : > { %1654 = vmatmul.mubr.bf16.gmra.mrb[4].mxu1 %v1865_v41 }
  0xb9   : > { %1670 = vmatpush3.bf16.msra.mxu1 %v1866_v40  ;;  %1657 = vmatprep.mubr.bf16.mxu1 %v1868_v42 }
  0xba   : > { %586 = vmatmul.mubr.bf16.gmra.mrb[8].mxu0 %v1836_v28  ;;  %1671 = vmatprep.subr.bf16.mxu1 %v1867_v43 }
  0xbb   : > { %593 = vmatprep.mubr.bf16.mxu0 %v1837_v29 }
  0xbd   : > { %1672 = vmatpush3.bf16.msra.mxu1 %v1867_v43 }
  0xbe   : > { %1673 = vmatprep.subr.bf16.mxu1 %v1870_v50 }
  0xc0   : > { %1658 = vmatmul.mubr.bf16.gmra.mrb[8].mxu1 %v1869_v46 }
  0xc1   : > { %1674 = vmatpush3.bf16.msra.mxu1 %v1870_v50  ;;  %1661 = vmatprep.mubr.bf16.mxu1 %v1872_v52 }
  0xc2   : > { %594 = vmatmul.mubr.bf16.gmra.mrb[12].mxu0 %v1839_v32  ;;  %1675 = vmatprep.subr.bf16.mxu1 %v1871_v51 }
  0xc3   : > { %601 = vmatprep.mubr.bf16.mxu0 %v1840_v33 }
  0xc5   : > { %1676 = vmatpush3.bf16.msra.mxu1 %v1871_v51 }
  0xc6   : > { %1677 = vmatprep.subr.bf16.mxu1 %v1874_v54 }
  0xc8   : > { %1662 = vmatmul.mubr.bf16.gmra.mrb[12].mxu1 %v1873_v53 }
  0xc9   : > { %1678 = vmatpush3.bf16.msra.mxu1 %v1874_v54 }
  0xca   : > { %602 = vmatmul.mubr.bf16.gmra.mrb[16].mxu0 %v1842_v38  ;;  %1679 = vmatprep.subr.bf16.mxu1 %v1875_v55 }
  0xcb   : > { %609 = vmatprep.mubr.bf16.mxu0 %v1843_v39 }
  0xcd   : > { %1680 = vmatpush3.bf16.msra.mxu1 %v1875_v55 }
  0xd2   : > { %610 = vmatmul.mubr.bf16.gmra.mrb[20].mxu0 %v1845_v44 }
  0xd3   : > { %617 = vmatprep.mubr.bf16.mxu0 %v1846_v45 }
  0xda   : > { %618 = vmatmul.mubr.bf16.gmra.mrb[24].mxu0 %v1848_v47 }
  0xdb   : > { %625 = vmatprep.mubr.bf16.mxu0 %v1849_v48  ;;  %v1449_v48 = vld [vmem:[%s2460_s4] ss:$0 sm:$0xff] }
  0xe2   : > { %626 = vmatmul.mubr.bf16.gmra.mrb[28].mxu0 %v1851_v49 }
 0x17d   : > { %v1553_v56 = vpop.f32.mrb[0].mxu0 }
 0x17e   : > { %v1554_v57 = vpop.f32.mrb[1].mxu0 }
 0x17f   : > { %v1555_v58 = vadd.f32 %v1554_v57, %v1553_v56  ;;  %v1556_v59 = vpop.f32.mrb[2].mxu0 }
 0x180   : > { %v1557_v60 = vpop.f32.mrb[3].mxu0 }
 0x181   : > { %v1558_v61 = vadd.f32 %v1557_v60, %v1556_v59 }
 0x183   : > { %v725_v62 = vpack.c.bf16 %v1558_v61, %v1555_v58 }
 0x185   : > { %v1559_v63 = vpop.f32.mrb[4].mxu0  ;;  %1681 = vmatprep.mubr.bf16.mxu1 %v725_v62 }
 0x186   : > { %v1560_v0 = vpop.f32.mrb[5].mxu0 }
 0x187   : > { %v1561_v1 = vadd.f32 %v1560_v0, %v1559_v63  ;;  %v1562_v2 = vpop.f32.mrb[6].mxu0 }
 0x188   : > { %v1563_v3 = vpop.f32.mrb[7].mxu0 }
 0x189   : > { %v1564_v4 = vadd.f32 %v1563_v3, %v1562_v2 }
 0x18b   : > { %v726_v5 = vpack.c.bf16 %v1564_v4, %v1561_v1 }
 0x18d   : > { %v1565_v6 = vpop.f32.mrb[8].mxu0  ;;  %1682 = vmatmul.mubr.bf16.vlgmr.msra.gmra.mrb[0].mxu1 %v726_v5 }
 0x18e   : > { %v1566_v7 = vpop.f32.mrb[9].mxu0 }
 0x18f   : > { %v1567_v8 = vadd.f32 %v1566_v7, %v1565_v6  ;;  %v1568_v9 = vpop.f32.mrb[10].mxu0 }
 0x190   : > { %v1569_v10 = vpop.f32.mrb[11].mxu0 }
 0x191   : > { %v1570_v11 = vadd.f32 %v1569_v10, %v1568_v9 }
 0x193   : > { %v727_v12 = vpack.c.bf16 %v1570_v11, %v1567_v8 }
 0x195   : > { %v1571_v13 = vpop.f32.mrb[12].mxu0  ;;  %1685 = vmatprep.mubr.bf16.mxu1 %v727_v12 }
 0x196   : > { %v1572_v14 = vpop.f32.mrb[13].mxu0 }
 0x197   : > { %v1573_v15 = vadd.f32 %v1572_v14, %v1571_v13  ;;  %v1574_v16 = vpop.f32.mrb[14].mxu0 }
 0x198   : > { %v1575_v17 = vpop.f32.mrb[15].mxu0 }
 0x199   : > { %v1576_v18 = vadd.f32 %v1575_v17, %v1574_v16 }
 0x19b   : > { %v728_v19 = vpack.c.bf16 %v1576_v18, %v1573_v15 }
 0x19d   : > { %v1577_v20 = vpop.f32.mrb[16].mxu0  ;;  %1686 = vmatmul.mubr.bf16.gmra.mrb[4].mxu1 %v728_v19 }
 0x19e   : > { %v1578_v21 = vpop.f32.mrb[17].mxu0 }
 0x19f   : > { %v1579_v22 = vadd.f32 %v1578_v21, %v1577_v20  ;;  %v1580_v23 = vpop.f32.mrb[18].mxu0 }
 0x1a0   : > { %v1581_v24 = vpop.f32.mrb[19].mxu0 }
 0x1a1   : > { %v1582_v25 = vadd.f32 %v1581_v24, %v1580_v23 }
 0x1a3   : > { %v729_v26 = vpack.c.bf16 %v1582_v25, %v1579_v22 }
 0x1a5   : > { %v1583_v27 = vpop.f32.mrb[20].mxu0  ;;  %1689 = vmatprep.mubr.bf16.mxu1 %v729_v26 }
 0x1a6   : > { %v1584_v28 = vpop.f32.mrb[21].mxu0 }
 0x1a7   : > { %v1585_v29 = vadd.f32 %v1584_v28, %v1583_v27  ;;  %v1586_v30 = vpop.f32.mrb[22].mxu0 }
 0x1a8   : > { %v1587_v31 = vpop.f32.mrb[23].mxu0 }
 0x1a9   : > { %v1588_v32 = vadd.f32 %v1587_v31, %v1586_v30 }
 0x1ab   : > { %v730_v33 = vpack.c.bf16 %v1588_v32, %v1585_v29 }
 0x1ad   : > { %v1589_v34 = vpop.f32.mrb[24].mxu0  ;;  %1690 = vmatmul.mubr.bf16.gmra.mrb[8].mxu1 %v730_v33 }
 0x1ae   : > { %v1590_v35 = vpop.f32.mrb[25].mxu0 }
 0x1af   : > { %v1591_v36 = vadd.f32 %v1590_v35, %v1589_v34  ;;  %v1592_v37 = vpop.f32.mrb[26].mxu0 }
 0x1b0   : > { %v1593_v38 = vpop.f32.mrb[27].mxu0 }
 0x1b1   : > { %v1594_v39 = vadd.f32 %v1593_v38, %v1592_v37 }
 0x1b3   : > { %v731_v40 = vpack.c.bf16 %v1594_v39, %v1591_v36 }
 0x1b5   : > { %v1595_v41 = vpop.f32.mrb[28].mxu0  ;;  %1693 = vmatprep.mubr.bf16.mxu1 %v731_v40 }
 0x1b6   : > { %v1596_v42 = vpop.f32.mrb[29].mxu0 }
 0x1b7   : > { %v1597_v43 = vadd.f32 %v1596_v42, %v1595_v41  ;;  %v1598_v44 = vpop.f32.mrb[30].mxu0 }
 0x1b8   : > { %v1599_v45 = vpop.f32.mrb[31].mxu0 }
 0x1b9   : > { %v1600_v46 = vadd.f32 %v1599_v45, %v1598_v44 }
 0x1bb   : > { %v732_v47 = vpack.c.bf16 %v1600_v46, %v1597_v43 }
 0x1bd   : > { %1694 = vmatmul.mubr.bf16.gmra.mrb[12].mxu1 %v732_v47 }
 0x260   : > { %v1683_v49 = vpop.f32.mrb[0].mxu1 }
 0x261   : > { %v1133_v50 = vadd.f32 %v1683_v49, %v1449_v48  ;;  %v1061_v51 = vpop.f32.mrb[1].mxu1 }
 0x262   : > { %v1131_v52 = vadd.f32 %v1449_v48, %v1061_v51  ;;  %v1684_v53 = vpop.f32.mrb[2].mxu1 }
 0x263   : > { %v1134_v54 = vadd.f32 %v1684_v53, %v1449_v48  ;;  %v1064_v55 = vpop.f32.mrb[3].mxu1  ;;  %v1149_v57 = vmax.f32 %v1133_v50, 0.0 }
 0x264   : > { %v1132_v56 = vadd.f32 %v1449_v48, %v1064_v55  ;;  %v1147_v59 = vmax.f32 %v1131_v52, 0.0 }
 0x265   : > { %v1150_v58 = vmax.f32 %v1134_v54, 0.0 }
 0x266   : > { %v1148_v60 = vmax.f32 %v1132_v56, 0.0 }
 0x267   : > { %v1498_v61 = vpack.c.bf16 %v1150_v58, %v1149_v57 }
 0x268   : > { %v1493_v62 = vpack.c.bf16 %v1148_v60, %v1147_v59 }
 0x269   : > { %1530 = vst [vmem:[%s2390_s14 + $0x8] sm:$0xff] %v1498_v61  }
 0x26a   : > { %1494 = vst [vmem:[%s2390_s14] sm:$0xff] %v1493_v62  }
 0x270   : > { %v1687_v63 = vpop.f32.mrb[4].mxu1 }
 0x271   : > { %v1137_v0 = vadd.f32 %v1687_v63, %v1449_v48  ;;  %v1077_v1 = vpop.f32.mrb[5].mxu1 }
 0x272   : > { %v1135_v2 = vadd.f32 %v1449_v48, %v1077_v1  ;;  %v1688_v3 = vpop.f32.mrb[6].mxu1 }
 0x273   : > { %v1138_v4 = vadd.f32 %v1688_v3, %v1449_v48  ;;  %v1080_v5 = vpop.f32.mrb[7].mxu1  ;;  %v1153_v7 = vmax.f32 %v1137_v0, 0.0 }
 0x274   : > { %v1136_v6 = vadd.f32 %v1449_v48, %v1080_v5  ;;  %v1151_v9 = vmax.f32 %v1135_v2, 0.0 }
 0x275   : > { %v1154_v8 = vmax.f32 %v1138_v4, 0.0 }
 0x276   : > { %v1152_v10 = vmax.f32 %v1136_v6, 0.0 }
 0x277   : > { %v1508_v11 = vpack.c.bf16 %v1154_v8, %v1153_v7 }
 0x278   : > { %v1503_v12 = vpack.c.bf16 %v1152_v10, %v1151_v9 }
 0x279   : > { %1532 = vst [vmem:[%s2390_s14 + $0x18] sm:$0xff] %v1508_v11  }
 0x27a   : > { %1531 = vst [vmem:[%s2390_s14 + $0x10] sm:$0xff] %v1503_v12  }
 0x280   : > { %v1691_v13 = vpop.f32.mrb[8].mxu1 }
 0x281   : > { %v1141_v14 = vadd.f32 %v1691_v13, %v1449_v48  ;;  %v1093_v15 = vpop.f32.mrb[9].mxu1 }
 0x282   : > { %v1139_v16 = vadd.f32 %v1449_v48, %v1093_v15  ;;  %v1692_v17 = vpop.f32.mrb[10].mxu1 }
 0x283   : > { %v1142_v18 = vadd.f32 %v1692_v17, %v1449_v48  ;;  %v1096_v19 = vpop.f32.mrb[11].mxu1  ;;  %v1157_v21 = vmax.f32 %v1141_v14, 0.0 }
 0x284   : > { %v1140_v20 = vadd.f32 %v1449_v48, %v1096_v19  ;;  %v1155_v23 = vmax.f32 %v1139_v16, 0.0 }
 0x285   : > { %v1158_v22 = vmax.f32 %v1142_v18, 0.0 }
 0x286   : > { %v1156_v24 = vmax.f32 %v1140_v20, 0.0 }
 0x287   : > { %v1518_v25 = vpack.c.bf16 %v1158_v22, %v1157_v21 }
 0x288   : > { %v1513_v26 = vpack.c.bf16 %v1156_v24, %v1155_v23 }
 0x289   : > { %1534 = vst [vmem:[%s2390_s14 + $0x28] sm:$0xff] %v1518_v25  }
 0x28a   : > { %1533 = vst [vmem:[%s2390_s14 + $0x20] sm:$0xff] %v1513_v26  }
 0x290   : > { %v1695_v27 = vpop.f32.mrb[12].mxu1 }
 0x291   : > { %v1145_v28 = vadd.f32 %v1695_v27, %v1449_v48  ;;  %v1109_v29 = vpop.f32.mrb[13].mxu1 }
 0x292   : > { %v1143_v30 = vadd.f32 %v1449_v48, %v1109_v29  ;;  %v1696_v31 = vpop.f32.mrb[14].mxu1 }
 0x293   : > { %v1146_v32 = vadd.f32 %v1696_v31, %v1449_v48  ;;  %v1112_v33 = vpop.f32.mrb[15].mxu1  ;;  %v1161_v35 = vmax.f32 %v1145_v28, 0.0 }
 0x294   : > { %v1144_v34 = vadd.f32 %v1449_v48, %v1112_v33  ;;  %v1159_v37 = vmax.f32 %v1143_v30, 0.0 }
 0x295   : > { %v1162_v36 = vmax.f32 %v1146_v32, 0.0 }
 0x296   : > { %v1160_v38 = vmax.f32 %v1144_v34, 0.0 }
 0x297   : > { %v1528_v39 = vpack.c.bf16 %v1162_v36, %v1161_v35 }
 0x298   : > { %v1523_v40 = vpack.c.bf16 %v1160_v38, %v1159_v37 }
 0x299   : > { %1536 = vst [vmem:[%s2390_s14 + $0x38] sm:$0xff] %v1528_v39  }
 0x29a   : > { %1535 = vst [vmem:[%s2390_s14 + $0x30] sm:$0xff] %v1523_v40  }
 0x29b   : > { %2003 = shalt.err (!%p2000_p0)
}
 0x29c   : > { %s2004_s28 = scalar_lea.hbm %s2405_s18, 1024  ;;  %s2008_s6 = scalar_lea.hbm %s2461_s5, 2048 }
 0x29d   : > { %p2005_p4 = scmp.ne.s32.totalorder %s2405_s18, %s2004_s28  ;;  %p2009_p12 = scmp.lt.u32.totalorder %s2405_s18, %s2461_s5 }
 0x29e   : > { %p2010_p1 = scmp.lt.u32.totalorder %s2008_s6, %s2004_s28  ;;  %p2012_p13 = scmp.lt.u32.totalorder %s2004_s28, %s2405_s18 }
 0x29f   : > { %p2006_p2 = pnand %p2005_p4, %p2283_p10 }
 0x2a0   : > { %p2011_p11 = por %p2010_p1, %p2009_p12 }
 0x2a1   : > { %p2007_p8 = pneg %p2006_p2 }
 0x2a2   : > { %p2013_p6 = por %p2012_p13, %p2011_p11 }
 0x2a4   : > { %p2014_p3 = pnand %p2013_p6, %p2007_p8 }
 0x2a6   : > { %2017 = shalt.err (!%p2014_p3)
}
 0x2a7   : > { %s2091_s14 = smov 64   ;;  %s2092_s17 = smov 4  }
 0x2a8   : > { %1727 = dma.vmem_to_hbm [thread:$0]  (%p2283_p10), %s2400_s16, 1024, %s2405_s18, %s1244_s15, %s2091_s14, %s2091_s14, %s2092_s17  }
 0x2a9 PF: > { %s2483_s25 = sld [smem:[#allocation16_spill]]  ;;  %s2484_s10 = sld [smem:[#allocation17_spill]] }
 0x2aa   : > { %p2486_p7 = scmp.ge.s32.totalorder %s2080_s23, 2 }
 0x2af   : > { %s1272_s21 = sand.u32 1, %s2483_s25   ;;  %p2485_p5 = scmp.ne.s32.totalorder %s2484_s10, 0 }
 0x2b0   : > { %s1273_s12 = scalar_lea.sflag [#allocation5], %s1272_s21 }
 0x2b1   : > { %p1744_p9 = pnand %p2486_p7, %p2485_p5 }
 0x2b3   : > { %2055 = dma.done.wait (!%p1744_p9), %s1273_s12, 1024  }
 0x2b4   : > { %2057 = vsyncadd (!%p1744_p9), %s1273_s12, 4294966272  ;;  %s23_s23 = sadd.s32 1, %s2080_s23   ;;  %s2487_s18 = smov %s2064_s19 }
 0x2b5   : > { %p20_p0 = scmp.ge.s32.totalorder %s23_s23, 4   ;;  %s2488_s19 = smov %s2068_s20 }
 0x2b6   : > { %s2489_s20 = smov %s2295_s13  ;;  %s2490_s21 = smov %s2076_s22 }
 0x2b7   : > { %s2491_s22 = smov %s2493_s8  ;;  %22 = sbr.rel (!%p20_p0) target bundleno = 8 (0x8), region = 111 }
 0x2be   :  { %1278 = vsyncpa [#allocation4], 1 }
 0x2bf   :  { %1280 = vsyncpa [#allocation4 + $0x1], 1 }
 0x2c0   :  { %1281 = vsyncpa [#allocation7], 1 }
 0x2c1   :  { %1282 = vsyncpa [#allocation10], 1 }
 0x2c2   :  { %1283 = vsyncpa [#allocation5], 1 }
 0x2c3   :  { %1285 = vsyncpa [#allocation5 + $0x1], 1 }

</bundles_post_ra>
